<compile_context>
chip_gen: v7x
topology: tpu7x:2x2x1
jax: 0.10.0
libtpu: 0.0.40
codegen_flags: <defaults>
</compile_context>

<pallas_src>
import functools
import math

import jax
import jax.numpy as jnp
from jax import lax
from jax.experimental import pallas as pl
from jax.experimental.pallas import tpu as pltpu

_VMEM_LIMIT_BYTES = 48 * 1024 * 1024  # fits v7x (64 MiB physical) as well as v5e/v6e (128 MiB)


# ---------------------------------------------------------------------------
# Tiling helpers
# ---------------------------------------------------------------------------
def _pick_row_tile(n, max_tile=512):
    """Largest multiple-of-8 tile <= max_tile that divides n, else the full dim."""
    for t in (512, 256, 128, 64, 32, 16, 8):
        if t <= max_tile and t <= n and n % t == 0:
            return t
    return n


def _pick_k_tile(n, max_tile=1024):
    """Contraction-dim tile: a multiple of 128 that divides n, else the full dim."""
    if n % 128 != 0:
        return n
    for t in (1024, 512, 256, 128):
        if t <= max_tile and n % t == 0:
            return t
    return n


def _compiler_params(dimension_semantics):
    return pltpu.CompilerParams(
        dimension_semantics=dimension_semantics,
        vmem_limit_bytes=_VMEM_LIMIT_BYTES,
    )


# ---------------------------------------------------------------------------
# Kernel 1: fused Q/K/V linear projections (row tiles x contraction tiles)
# ---------------------------------------------------------------------------
def _qkv_proj_kernel(xq_ref, xk_ref, xv_ref,
                     wq_ref, wk_ref, wv_ref,
                     bq_ref, bk_ref, bv_ref,
                     qo_ref, ko_ref, vo_ref,
                     qacc, kacc, vacc, *, compute_dtype):
    kt = pl.program_id(1)

    @pl.when(kt == 0)
    def _init():
        qacc[...] = jnp.zeros_like(qacc)
        kacc[...] = jnp.zeros_like(kacc)
        vacc[...] = jnp.zeros_like(vacc)

    cdt = compute_dtype
    qacc[...] += jnp.dot(xq_ref[...].astype(cdt), wq_ref[...],
                         preferred_element_type=jnp.float32)
    kacc[...] += jnp.dot(xk_ref[...].astype(cdt), wk_ref[...],
                         preferred_element_type=jnp.float32)
    vacc[...] += jnp.dot(xv_ref[...].astype(cdt), wv_ref[...],
                         preferred_element_type=jnp.float32)

    @pl.when(kt == pl.num_programs(1) - 1)
    def _finalize():
        qo_ref[...] = (qacc[...] + bq_ref[...]).astype(qo_ref.dtype)
        ko_ref[...] = (kacc[...] + bk_ref[...]).astype(ko_ref.dtype)
        vo_ref[...] = (vacc[...] + bv_ref[...]).astype(vo_ref.dtype)


def qkv_projection_pallas(xq, xk, xv, wq_t, wk_t, wv_t, bq, bk, bv, out_dtype):
    """Fused q/k/v projections.  x*: (M, d_model); w*_t: (d_model, d_out); b*: (1, d_out)."""
    M, D = xq.shape
    n_qk = wq_t.shape[1]
    n_v = wv_t.shape[1]
    TM = _pick_row_tile(M)
    TK = _pick_k_tile(D)
    kern = functools.partial(_qkv_proj_kernel, compute_dtype=wq_t.dtype)
    return pl.pallas_call(
        kern,
        out_shape=(jax.ShapeDtypeStruct((M, n_qk), out_dtype),
                   jax.ShapeDtypeStruct((M, n_qk), out_dtype),
                   jax.ShapeDtypeStruct((M, n_v), out_dtype)),
        grid_spec=pltpu.PrefetchScalarGridSpec(
            num_scalar_prefetch=0,
            grid=(M // TM, D // TK),
            in_specs=[
                pl.BlockSpec((TM, TK), lambda m, kt: (m, kt)),
                pl.BlockSpec((TM, TK), lambda m, kt: (m, kt)),
                pl.BlockSpec((TM, TK), lambda m, kt: (m, kt)),
                pl.BlockSpec((TK, n_qk), lambda m, kt: (kt, 0)),
                pl.BlockSpec((TK, n_qk), lambda m, kt: (kt, 0)),
                pl.BlockSpec((TK, n_v), lambda m, kt: (kt, 0)),
                pl.BlockSpec((1, n_qk), lambda m, kt: (0, 0)),
                pl.BlockSpec((1, n_qk), lambda m, kt: (0, 0)),
                pl.BlockSpec((1, n_v), lambda m, kt: (0, 0)),
            ],
            out_specs=[
                pl.BlockSpec((TM, n_qk), lambda m, kt: (m, 0)),
                pl.BlockSpec((TM, n_qk), lambda m, kt: (m, 0)),
                pl.BlockSpec((TM, n_v), lambda m, kt: (m, 0)),
            ],
            scratch_shapes=[pltpu.VMEM((TM, n_qk), jnp.float32),
                            pltpu.VMEM((TM, n_qk), jnp.float32),
                            pltpu.VMEM((TM, n_v), jnp.float32)],
        ),
        compiler_params=_compiler_params(("parallel", "arbitrary")),
    )(xq, xk, xv, wq_t, wk_t, wv_t, bq, bk, bv)


# ---------------------------------------------------------------------------
# Fallback single linear (used only for cross-attention, len_q != len_k)
# ---------------------------------------------------------------------------
def _linear_kernel(x_ref, w_ref, b_ref, o_ref, acc, *, compute_dtype):
    kt = pl.program_id(1)

    @pl.when(kt == 0)
    def _init():
        acc[...] = jnp.zeros_like(acc)

    acc[...] += jnp.dot(x_ref[...].astype(compute_dtype), w_ref[...],
                        preferred_element_type=jnp.float32)

    @pl.when(kt == pl.num_programs(1) - 1)
    def _finalize():
        o_ref[...] = (acc[...] + b_ref[...]).astype(o_ref.dtype)


def linear_pallas(x, w_t, b, out_dtype):
    """y = x @ w_t + b  with x: (M, d_in), w_t: (d_in, d_out), b: (1, d_out)."""
    M, D = x.shape
    N = w_t.shape[1]
    TM = _pick_row_tile(M)
    TK = _pick_k_tile(D)
    kern = functools.partial(_linear_kernel, compute_dtype=w_t.dtype)
    return pl.pallas_call(
        kern,
        out_shape=jax.ShapeDtypeStruct((M, N), out_dtype),
        grid_spec=pltpu.PrefetchScalarGridSpec(
            num_scalar_prefetch=0,
            grid=(M // TM, D // TK),
            in_specs=[
                pl.BlockSpec((TM, TK), lambda m, kt: (m, kt)),
                pl.BlockSpec((TK, N), lambda m, kt: (kt, 0)),
                pl.BlockSpec((1, N), lambda m, kt: (0, 0)),
            ],
            out_specs=pl.BlockSpec((TM, N), lambda m, kt: (m, 0)),
            scratch_shapes=[pltpu.VMEM((TM, N), jnp.float32)],
        ),
        compiler_params=_compiler_params(("parallel", "arbitrary")),
    )(x, w_t, b)


# ---------------------------------------------------------------------------
# Kernel 2: attention (all heads) + fc + residual + LayerNorm, per (batch, q-tile)
# ---------------------------------------------------------------------------
def _attn_fc_ln_kernel(*refs, n_head, d_k, d_v, inv_temp, eps,
                       compute_dtype, has_mask, return_attn):
    q_ref, k_ref, v_ref = refs[0], refs[1], refs[2]
    pos = 3
    m_ref = None
    if has_mask:
        m_ref = refs[pos]
        pos += 1
    res_ref, w_ref, b_ref, g_ref, beta_ref = refs[pos:pos + 5]
    pos += 5
    o_ref = refs[pos]
    a_ref = refs[pos + 1] if return_attn else None

    cdt = compute_dtype
    q_all = q_ref[0]                    # (TQ, H*d_k)
    k_all = k_ref[0]                    # (Lk, H*d_k)
    v_all = v_ref[0].astype(cdt)        # (Lk, H*d_v)
    tq = q_all.shape[0]
    d_model = w_ref.shape[1]

    if has_mask:
        masked = m_ref[0] != 0          # (TQ, Lk)

    # fc(concat_h ctx_h) == sum_h ctx_h @ W_fc_t[h*d_v:(h+1)*d_v, :]
    y = jnp.zeros((tq, d_model), jnp.float32)
    for h in range(n_head):
        qh = (q_all[:, h * d_k:(h + 1) * d_k] * inv_temp).astype(cdt)  # fold 1/temperature into q
        kh = k_all[:, h * d_k:(h + 1) * d_k].astype(cdt)
        vh = v_all[:, h * d_v:(h + 1) * d_v]
        # scores = qh @ kh^T : contract the last dims — no in-kernel transpose.
        s = lax.dot_general(qh, kh, (((1,), (1,)), ((), ())),
                            preferred_element_type=jnp.float32)        # (TQ, Lk) f32
        if has_mask:
            s = jnp.where(masked, -jnp.inf, s)
        m = jnp.max(s, axis=-1, keepdims=True)
        e = jnp.exp(s - m)
        # TODO(synk): pl.reciprocal(..., approx=True) would push this onto the EUP slot
        # (~2^-12 rel. error); kept exact so the returned attn matches torch softmax tightly.
        p = e * pl.reciprocal(jnp.sum(e, axis=-1, keepdims=True), approx=False)
        if return_attn:
            a_ref[h, 0] = p.astype(a_ref.dtype)
        ctx_h = jnp.dot(p.astype(cdt), vh, preferred_element_type=jnp.float32)  # (TQ, d_v)
        w_h = w_ref[h * d_v:(h + 1) * d_v, :]                                   # (d_v, d_model)
        y = y + jnp.dot(ctx_h.astype(cdt), w_h, preferred_element_type=jnp.float32)

    # fc bias + residual + LayerNorm (statistics in f32)
    z = y + b_ref[...] + res_ref[0].astype(jnp.float32)
    mu = jnp.mean(z, axis=-1, keepdims=True)
    zc = z - mu
    var = jnp.mean(zc * zc, axis=-1, keepdims=True)
    zn = zc * lax.rsqrt(var + eps)
    o_ref[0] = (zn * g_ref[...] + beta_ref[...]).astype(o_ref.dtype)


def attention_fc_ln_pallas(qp, kp, vp, residual, fc_w_t, fc_b2, ln_g2, ln_b2,
                           n_head, d_k, d_v, *, mask=None, return_attn=True,
                           eps=1e-5, attn_dtype=jnp.float32):
    B, Lq, _ = qp.shape
    _, Lk, _ = kp.shape
    h_dk = n_head * d_k
    h_dv = n_head * d_v
    d_model = fc_w_t.shape[1]
    TQ = _pick_row_tile(Lq, max_tile=256)
    inv_temp = 1.0 / (float(d_k) ** 0.5)
    has_mask = mask is not None

    kern = functools.partial(
        _attn_fc_ln_kernel, n_head=n_head, d_k=d_k, d_v=d_v, inv_temp=inv_temp,
        eps=eps, compute_dtype=fc_w_t.dtype, has_mask=has_mask, return_attn=return_attn)

    in_specs = [
        pl.BlockSpec((1, TQ, h_dk), lambda b, qt: (b, qt, 0)),   # q projection tile
        pl.BlockSpec((1, Lk, h_dk), lambda b, qt: (b, 0, 0)),    # k projection (full length)
        pl.BlockSpec((1, Lk, h_dv), lambda b, qt: (b, 0, 0)),    # v projection (full length)
    ]
    inputs = [qp, kp, vp]
    if has_mask:
        in_specs.append(pl.BlockSpec((1, TQ, Lk), lambda b, qt: (b, qt, 0)))
        inputs.append(mask.astype(jnp.int32))
    in_specs += [
        pl.BlockSpec((1, TQ, d_model), lambda b, qt: (b, qt, 0)),  # residual
        pl.BlockSpec((h_dv, d_model), lambda b, qt: (0, 0)),       # fc weight (pre-transposed)
        pl.BlockSpec((1, d_model), lambda b, qt: (0, 0)),          # fc bias
        pl.BlockSpec((1, d_model), lambda b, qt: (0, 0)),          # LayerNorm gamma
        pl.BlockSpec((1, d_model), lambda b, qt: (0, 0)),          # LayerNorm beta
    ]
    inputs += [residual, fc_w_t, fc_b2, ln_g2, ln_b2]

    out_shape = [jax.ShapeDtypeStruct((B, Lq, d_model), residual.dtype)]
    out_specs = [pl.BlockSpec((1, TQ, d_model), lambda b, qt: (b, qt, 0))]
    if return_attn:
        out_shape.append(jax.ShapeDtypeStruct((n_head, B, Lq, Lk), attn_dtype))
        out_specs.append(pl.BlockSpec((n_head, 1, TQ, Lk), lambda b, qt: (0, b, qt, 0)))

    results = pl.pallas_call(
        kern,
        out_shape=tuple(out_shape),
        grid_spec=pltpu.PrefetchScalarGridSpec(
            num_scalar_prefetch=0,
            grid=(B, Lq // TQ),
            in_specs=in_specs,
            out_specs=out_specs,
        ),
        compiler_params=_compiler_params(("parallel", "parallel")),
    )(*inputs)
    if return_attn:
        out, attn = results
        return out, attn
    (out,) = results
    return out, None


# ---------------------------------------------------------------------------
# Full MultiHeadAttention forward
# ---------------------------------------------------------------------------
def multi_head_attention(params, q, k, v, n_head, d_k, d_v, *, mask=None,
                         compute_dtype=None, return_attn=True):
    """Forward of the PyTorch MultiHeadAttention module (eval mode: dropout = identity).

    q, k, v: (sz_b, len, d_model); params in PyTorch nn.Linear layout (out, in).
    mask: optional (sz_b, len_q, len_k); nonzero entries are filled with -inf before the
    softmax and shared across heads (like torch's mask.repeat(n_head, 1, 1)).
    compute_dtype: set to jnp.bfloat16 to feed the MXU bf16 (f32 accumulation kept).
    Returns (output (sz_b, len_q, d_model), attn (n_head*sz_b, len_q, len_k) or None).
    """
    B, Lq, d_model = q.shape
    _, Lk, _ = k.shape
    _, Lv, _ = v.shape
    h_dk = n_head * d_k
    h_dv = n_head * d_v
    cdt = jnp.dtype(q.dtype) if compute_dtype is None else jnp.dtype(compute_dtype)

    # Pre-transpose (and cast, for the bf16 path) the weights once on the host — no `.T`
    # inside any kernel.  In a real model these would simply be stored as (d_in, d_out).
    wq_t = params["w_qs_w"].T.astype(cdt)         # (d_model, H*d_k)
    wk_t = params["w_ks_w"].T.astype(cdt)
    wv_t = params["w_vs_w"].T.astype(cdt)         # (d_model, H*d_v)
    fc_w_t = params["fc_w"].T.astype(cdt)         # (H*d_v, d_model)
    bq = params["w_qs_b"].reshape(1, h_dk).astype(jnp.float32)
    bk = params["w_ks_b"].reshape(1, h_dk).astype(jnp.float32)
    bv = params["w_vs_b"].reshape(1, h_dv).astype(jnp.float32)
    fc_b = params["fc_b"].reshape(1, d_model).astype(jnp.float32)
    ln_g = params["ln_g"].reshape(1, d_model).astype(jnp.float32)
    ln_b = params["ln_b"].reshape(1, d_model).astype(jnp.float32)

    if Lq == Lk == Lv:
        qp2, kp2, vp2 = qkv_projection_pallas(
            q.reshape(B * Lq, d_model), k.reshape(B * Lk, d_model),
            v.reshape(B * Lv, d_model), wq_t, wk_t, wv_t, bq, bk, bv, cdt)
    else:
        # Cross-attention (len_q != len_k): project each stream with the same tiled kernel.
        qp2 = linear_pallas(q.reshape(B * Lq, d_model), wq_t, bq, cdt)
        kp2 = linear_pallas(k.reshape(B * Lk, d_model), wk_t, bk, cdt)
        vp2 = linear_pallas(v.reshape(B * Lv, d_model), wv_t, bv, cdt)

    # Pure reshapes (no transposes): the head axis is split inside kernel 2.
    qp = qp2.reshape(B, Lq, h_dk)
    kp = kp2.reshape(B, Lk, h_dk)
    vp = vp2.reshape(B, Lv, h_dv)

    out, attn4 = attention_fc_ln_pallas(
        qp, kp, vp, q, fc_w_t, fc_b, ln_g, ln_b, n_head, d_k, d_v,
        mask=mask, return_attn=return_attn)
    if not return_attn:
        return out, None
    # (H, B, Lq, Lk) -> (H*B, Lq, Lk): heads-major like torch, a free reshape (no transpose).
    attn = attn4.reshape(n_head * B, Lq, Lk)
    return out, attn


# ---------------------------------------------------------------------------
# Pure-JAX reference (sanity check)
# ---------------------------------------------------------------------------
def reference_mha(params, q, k, v, n_head, d_k, d_v, mask=None):
    sz_b, len_q, d_model = q.shape
    residual = q
    qp = q @ params["w_qs_w"].T + params["w_qs_b"]
    kp = k @ params["w_ks_w"].T + params["w_ks_b"]
    vp = v @ params["w_vs_w"].T + params["w_vs_b"]

    def split(x, d):
        B, L, _ = x.shape
        return x.reshape(B, L, n_head, d).transpose(2, 0, 1, 3).reshape(-1, L, d)

    qh, kh, vh = split(qp, d_k), split(kp, d_k), split(vp, d_v)
    scores = jnp.einsum("bqd,bkd->bqk", qh, kh) / (float(d_k) ** 0.5)
    if mask is not None:
        mrep = jnp.tile(mask.astype(bool), (n_head, 1, 1))
        scores = jnp.where(mrep, -jnp.inf, scores)
    attn = jax.nn.softmax(scores, axis=2)
    out = jnp.einsum("bqk,bkd->bqd", attn, vh)
    out = (out.reshape(n_head, sz_b, len_q, d_v)
              .transpose(1, 2, 0, 3)
              .reshape(sz_b, len_q, n_head * d_v))
    y = out @ params["fc_w"].T + params["fc_b"] + residual
    mu = jnp.mean(y, axis=-1, keepdims=True)
    var = jnp.mean((y - mu) ** 2, axis=-1, keepdims=True)
    y = (y - mu) / jnp.sqrt(var + 1e-5) * params["ln_g"] + params["ln_b"]
    return y, attn


# ---------------------------------------------------------------------------
def init_params(key, n_head, d_model, d_k, d_v):
    ks = jax.random.split(key, 8)
    std_qk = math.sqrt(2.0 / (d_model + d_k))
    std_v = math.sqrt(2.0 / (d_model + d_v))
    fan_lin = 1.0 / math.sqrt(d_model)
    xavier_fc = math.sqrt(2.0 / (n_head * d_v + d_model))
    return {
        "w_qs_w": jax.random.normal(ks[0], (n_head * d_k, d_model), jnp.float32) * std_qk,
        "w_qs_b": jax.random.uniform(ks[1], (n_head * d_k,), jnp.float32, -fan_lin, fan_lin),
        "w_ks_w": jax.random.normal(ks[2], (n_head * d_k, d_model), jnp.float32) * std_qk,
        "w_ks_b": jax.random.uniform(ks[3], (n_head * d_k,), jnp.float32, -fan_lin, fan_lin),
        "w_vs_w": jax.random.normal(ks[4], (n_head * d_v, d_model), jnp.float32) * std_v,
        "w_vs_b": jax.random.uniform(ks[5], (n_head * d_v,), jnp.float32, -fan_lin, fan_lin),
        "fc_w": jax.random.normal(ks[6], (d_model, n_head * d_v), jnp.float32) * xavier_fc,
        "fc_b": jnp.zeros((d_model,), jnp.float32),
        "ln_g": jnp.ones((d_model,), jnp.float32),
        "ln_b": jnp.zeros((d_model,), jnp.float32),
    }


if __name__ == "__main__":
    n_head, d_model, d_k, d_v = 4, 32, 8, 8
    B, L = 2, 8

    key = jax.random.PRNGKey(0)
    kp_, kq, kk, kv = jax.random.split(key, 4)
    params = init_params(kp_, n_head, d_model, d_k, d_v)

    q = jax.random.normal(kq, (B, L, d_model), jnp.float32)
    k = jax.random.normal(kk, (B, L, d_model), jnp.float32)
    v = jax.random.normal(kv, (B, L, d_model), jnp.float32)

    # 1) f32 path, no mask (matches the eval-mode PyTorch forward)
    out, attn = multi_head_attention(params, q, k, v, n_head, d_k, d_v)
    out, attn = jax.block_until_ready((out, attn))
    ref_out, ref_attn = reference_mha(params, q, k, v, n_head, d_k, d_v)
    assert out.shape == (B, L, d_model)
    assert attn.shape == (n_head * B, L, L)
    assert jnp.allclose(out, ref_out, atol=1e-4, rtol=1e-4)
    assert jnp.allclose(attn, ref_attn, atol=1e-5, rtol=1e-5)

    # 2) f32 path with a causal mask (nonzero => masked, like torch masked_fill)
    tri = (jnp.arange(L)[:, None] < jnp.arange(L)[None, :]).astype(jnp.int32)
    mask = jnp.broadcast_to(tri[None], (B, L, L))
    out_m, attn_m = multi_head_attention(params, q, k, v, n_head, d_k, d_v, mask=mask)
    jax.block_until_ready(out_m)
    ref_out_m, ref_attn_m = reference_mha(params, q, k, v, n_head, d_k, d_v, mask=mask)
    assert jnp.allclose(out_m, ref_out_m, atol=1e-4, rtol=1e-4)
    assert jnp.allclose(attn_m, ref_attn_m, atol=1e-5, rtol=1e-5)

    # 3) cross-attention (len_q != len_k) exercises the un-fused projection path
    Lk2 = 16
    k2 = jax.random.normal(jax.random.fold_in(key, 1), (B, Lk2, d_model), jnp.float32)
    v2 = jax.random.normal(jax.random.fold_in(key, 2), (B, Lk2, d_model), jnp.float32)
    out_x, attn_x = multi_head_attention(params, q, k2, v2, n_head, d_k, d_v)
    jax.block_until_ready(out_x)
    ref_out_x, ref_attn_x = reference_mha(params, q, k2, v2, n_head, d_k, d_v)
    assert attn_x.shape == (n_head * B, L, Lk2)
    assert jnp.allclose(out_x, ref_out_x, atol=1e-4, rtol=1e-4)
    assert jnp.allclose(attn_x, ref_attn_x, atol=1e-5, rtol=1e-5)

    # 4) bf16-MXU path (v6e/v7x feedback): f32 accumulation, looser tolerance vs f32 ref
    out_bf, attn_bf = multi_head_attention(params, q, k, v, n_head, d_k, d_v,
                                           compute_dtype=jnp.bfloat16)
    jax.block_until_ready(out_bf)
    assert jnp.allclose(out_bf, ref_out, atol=3e-2, rtol=3e-2)
    assert jnp.allclose(attn_bf, ref_attn, atol=2e-2, rtol=2e-2)

    # 5) attention-probability output is optional (skips the O(L^2) HBM store entirely)
    out_na, attn_na = multi_head_attention(params, q, k, v, n_head, d_k, d_v,
                                           return_attn=False)
    jax.block_until_ready(out_na)
    assert attn_na is None
    assert jnp.allclose(out_na, ref_out, atol=1e-4, rtol=1e-4)

    print("KERNEL_OK")
</pallas_src>

<mosaic_0001>
module attributes {stable_mosaic.version = 11 : i64} {
  func.func @_qkv_proj_kernel(%arg0: i32, %arg1: i32, %arg2: memref<16x32xf32, #tpu.memory_space<vmem>>, %arg3: memref<16x32xf32, #tpu.memory_space<vmem>>, %arg4: memref<16x32xf32, #tpu.memory_space<vmem>>, %arg5: memref<32x32xf32, #tpu.memory_space<vmem>>, %arg6: memref<32x32xf32, #tpu.memory_space<vmem>>, %arg7: memref<32x32xf32, #tpu.memory_space<vmem>>, %arg8: memref<1x32xf32, #tpu.memory_space<vmem>>, %arg9: memref<1x32xf32, #tpu.memory_space<vmem>>, %arg10: memref<1x32xf32, #tpu.memory_space<vmem>>, %arg11: memref<16x32xf32, #tpu.memory_space<vmem>>, %arg12: memref<16x32xf32, #tpu.memory_space<vmem>>, %arg13: memref<16x32xf32, #tpu.memory_space<vmem>>, %arg14: memref<16x32xf32, #tpu.memory_space<vmem>>, %arg15: memref<16x32xf32, #tpu.memory_space<vmem>>, %arg16: memref<16x32xf32, #tpu.memory_space<vmem>>) attributes {dimension_semantics = [#tpu.dimension_semantics<parallel>, #tpu.dimension_semantics<arbitrary>], iteration_bounds = array<i64: 1, 1>, scalar_prefetch = 0 : i64, scratch_operands = 3 : i64, tpu.core_type = #tpu.core_type<tc>, window_params = [{transform_indices = @transform_0, window_bounds = array<i64: 16, 32>}, {transform_indices = @transform_1, window_bounds = array<i64: 16, 32>}, {transform_indices = @transform_2, window_bounds = array<i64: 16, 32>}, {transform_indices = @transform_3, window_bounds = array<i64: 32, 32>}, {transform_indices = @transform_4, window_bounds = array<i64: 32, 32>}, {transform_indices = @transform_5, window_bounds = array<i64: 32, 32>}, {pipeline_mode = #tpu.pipeline_mode<synchronous>, transform_indices = @transform_6, window_bounds = array<i64: 1, 32>}, {pipeline_mode = #tpu.pipeline_mode<synchronous>, transform_indices = @transform_7, window_bounds = array<i64: 1, 32>}, {pipeline_mode = #tpu.pipeline_mode<synchronous>, transform_indices = @transform_8, window_bounds = array<i64: 1, 32>}, {transform_indices = @transform_9, window_bounds = array<i64: 16, 32>}, {transform_indices = @transform_10, window_bounds = array<i64: 16, 32>}, {transform_indices = @transform_11, window_bounds = array<i64: 16, 32>}]} {
    %c0_i32 = arith.constant 0 : i32
    %0 = arith.cmpi eq, %arg1, %c0_i32 : i32
    %1 = arith.extui %0 : i1 to i32
    %c0_i32_0 = arith.constant 0 : i32
    %2 = arith.cmpi ne, %1, %c0_i32_0 : i32
    scf.if %2 {
      %cst_28 = arith.constant 0.000000e+00 : f32
      %24 = vector.broadcast %cst_28 : f32 to vector<16x32xf32>
      %c0_29 = arith.constant 0 : index
      %c0_30 = arith.constant 0 : index
      %25 = vector.load %arg14[%c0_29, %c0_30] : memref<16x32xf32, #tpu.memory_space<vmem>>, vector<16x32xf32>
      tpu.vector_store %arg14[%c0_29, %c0_30], %24 {strides = array<i32>} : memref<16x32xf32, #tpu.memory_space<vmem>>, vector<16x32xf32>,
      %cst_31 = arith.constant 0.000000e+00 : f32
      %26 = vector.broadcast %cst_31 : f32 to vector<16x32xf32>
      %c0_32 = arith.constant 0 : index
      %c0_33 = arith.constant 0 : index
      %27 = vector.load %arg15[%c0_32, %c0_33] : memref<16x32xf32, #tpu.memory_space<vmem>>, vector<16x32xf32>
      tpu.vector_store %arg15[%c0_32, %c0_33], %26 {strides = array<i32>} : memref<16x32xf32, #tpu.memory_space<vmem>>, vector<16x32xf32>,
      %cst_34 = arith.constant 0.000000e+00 : f32
      %28 = vector.broadcast %cst_34 : f32 to vector<16x32xf32>
      %c0_35 = arith.constant 0 : index
      %c0_36 = arith.constant 0 : index
      %29 = vector.load %arg16[%c0_35, %c0_36] : memref<16x32xf32, #tpu.memory_space<vmem>>, vector<16x32xf32>
      tpu.vector_store %arg16[%c0_35, %c0_36], %28 {strides = array<i32>} : memref<16x32xf32, #tpu.memory_space<vmem>>, vector<16x32xf32>,
    } else {
    }
    %c0 = arith.constant 0 : index
    %c0_1 = arith.constant 0 : index
    %3 = vector.load %arg14[%c0, %c0_1] : memref<16x32xf32, #tpu.memory_space<vmem>>, vector<16x32xf32>
    %c0_2 = arith.constant 0 : index
    %c0_3 = arith.constant 0 : index
    %4 = vector.load %arg2[%c0_2, %c0_3] : memref<16x32xf32, #tpu.memory_space<vmem>>, vector<16x32xf32>
    %c0_4 = arith.constant 0 : index
    %c0_5 = arith.constant 0 : index
    %5 = vector.load %arg5[%c0_4, %c0_5] : memref<32x32xf32, #tpu.memory_space<vmem>>, vector<32x32xf32>
    %cst = arith.constant dense<0.000000e+00> : vector<16x32xf32>
    %6 = tpu.matmul %4, %5, %cst {dimension_numbers = #tpu.dot_dimension_numbers<[1], [0], [0], [1], [0, 0, 1, 1], [], []>} : vector<16x32xf32>, vector<32x32xf32>, vector<16x32xf32> -> vector<16x32xf32>
    %7 = arith.addf %3, %6 : vector<16x32xf32>
    %c0_6 = arith.constant 0 : index
    %c0_7 = arith.constant 0 : index
    %8 = vector.load %arg14[%c0_6, %c0_7] : memref<16x32xf32, #tpu.memory_space<vmem>>, vector<16x32xf32>
    tpu.vector_store %arg14[%c0_6, %c0_7], %7 {strides = array<i32>} : memref<16x32xf32, #tpu.memory_space<vmem>>, vector<16x32xf32>,
    %c0_8 = arith.constant 0 : index
    %c0_9 = arith.constant 0 : index
    %9 = vector.load %arg15[%c0_8, %c0_9] : memref<16x32xf32, #tpu.memory_space<vmem>>, vector<16x32xf32>
    %c0_10 = arith.constant 0 : index
    %c0_11 = arith.constant 0 : index
    %10 = vector.load %arg3[%c0_10, %c0_11] : memref<16x32xf32, #tpu.memory_space<vmem>>, vector<16x32xf32>
    %c0_12 = arith.constant 0 : index
    %c0_13 = arith.constant 0 : index
    %11 = vector.load %arg6[%c0_12, %c0_13] : memref<32x32xf32, #tpu.memory_space<vmem>>, vector<32x32xf32>
    %cst_14 = arith.constant dense<0.000000e+00> : vector<16x32xf32>
    %12 = tpu.matmul %10, %11, %cst_14 {dimension_numbers = #tpu.dot_dimension_numbers<[1], [0], [0], [1], [0, 0, 1, 1], [], []>} : vector<16x32xf32>, vector<32x32xf32>, vector<16x32xf32> -> vector<16x32xf32>
    %13 = arith.addf %9, %12 : vector<16x32xf32>
    %c0_15 = arith.constant 0 : index
    %c0_16 = arith.constant 0 : index
    %14 = vector.load %arg15[%c0_15, %c0_16] : memref<16x32xf32, #tpu.memory_space<vmem>>, vector<16x32xf32>
    tpu.vector_store %arg15[%c0_15, %c0_16], %13 {strides = array<i32>} : memref<16x32xf32, #tpu.memory_space<vmem>>, vector<16x32xf32>,
    %c0_17 = arith.constant 0 : index
    %c0_18 = arith.constant 0 : index
    %15 = vector.load %arg16[%c0_17, %c0_18] : memref<16x32xf32, #tpu.memory_space<vmem>>, vector<16x32xf32>
    %c0_19 = arith.constant 0 : index
    %c0_20 = arith.constant 0 : index
    %16 = vector.load %arg4[%c0_19, %c0_20] : memref<16x32xf32, #tpu.memory_space<vmem>>, vector<16x32xf32>
    %c0_21 = arith.constant 0 : index
    %c0_22 = arith.constant 0 : index
    %17 = vector.load %arg7[%c0_21, %c0_22] : memref<32x32xf32, #tpu.memory_space<vmem>>, vector<32x32xf32>
    %cst_23 = arith.constant dense<0.000000e+00> : vector<16x32xf32>
    %18 = tpu.matmul %16, %17, %cst_23 {dimension_numbers = #tpu.dot_dimension_numbers<[1], [0], [0], [1], [0, 0, 1, 1], [], []>} : vector<16x32xf32>, vector<32x32xf32>, vector<16x32xf32> -> vector<16x32xf32>
    %19 = arith.addf %15, %18 : vector<16x32xf32>
    %c0_24 = arith.constant 0 : index
    %c0_25 = arith.constant 0 : index
    %20 = vector.load %arg16[%c0_24, %c0_25] : memref<16x32xf32, #tpu.memory_space<vmem>>, vector<16x32xf32>
    tpu.vector_store %arg16[%c0_24, %c0_25], %19 {strides = array<i32>} : memref<16x32xf32, #tpu.memory_space<vmem>>, vector<16x32xf32>,
    %c0_i32_26 = arith.constant 0 : i32
    %21 = arith.cmpi eq, %arg1, %c0_i32_26 : i32
    %22 = arith.extui %21 : i1 to i32
    %c0_i32_27 = arith.constant 0 : i32
    %23 = arith.cmpi ne, %22, %c0_i32_27 : i32
    scf.if %23 {
      %c0_28 = arith.constant 0 : index
      %c0_29 = arith.constant 0 : index
      %24 = vector.load %arg14[%c0_28, %c0_29] : memref<16x32xf32, #tpu.memory_space<vmem>>, vector<16x32xf32>
      %c0_30 = arith.constant 0 : index
      %c0_31 = arith.constant 0 : index
      %25 = vector.load %arg8[%c0_30, %c0_31] : memref<1x32xf32, #tpu.memory_space<vmem>>, vector<1x32xf32>
      %26 = vector.broadcast %25 : vector<1x32xf32> to vector<16x32xf32>
      %27 = arith.addf %24, %26 : vector<16x32xf32>
      %c0_32 = arith.constant 0 : index
      %c0_33 = arith.constant 0 : index
      %28 = vector.load %arg11[%c0_32, %c0_33] : memref<16x32xf32, #tpu.memory_space<vmem>>, vector<16x32xf32>
      tpu.vector_store %arg11[%c0_32, %c0_33], %27 {strides = array<i32>} : memref<16x32xf32, #tpu.memory_space<vmem>>, vector<16x32xf32>,
      %c0_34 = arith.constant 0 : index
      %c0_35 = arith.constant 0 : index
      %29 = vector.load %arg15[%c0_34, %c0_35] : memref<16x32xf32, #tpu.memory_space<vmem>>, vector<16x32xf32>
      %c0_36 = arith.constant 0 : index
      %c0_37 = arith.constant 0 : index
      %30 = vector.load %arg9[%c0_36, %c0_37] : memref<1x32xf32, #tpu.memory_space<vmem>>, vector<1x32xf32>
      %31 = vector.broadcast %30 : vector<1x32xf32> to vector<16x32xf32>
      %32 = arith.addf %29, %31 : vector<16x32xf32>
      %c0_38 = arith.constant 0 : index
      %c0_39 = arith.constant 0 : index
      %33 = vector.load %arg12[%c0_38, %c0_39] : memref<16x32xf32, #tpu.memory_space<vmem>>, vector<16x32xf32>
      tpu.vector_store %arg12[%c0_38, %c0_39], %32 {strides = array<i32>} : memref<16x32xf32, #tpu.memory_space<vmem>>, vector<16x32xf32>,
      %c0_40 = arith.constant 0 : index
      %c0_41 = arith.constant 0 : index
      %34 = vector.load %arg16[%c0_40, %c0_41] : memref<16x32xf32, #tpu.memory_space<vmem>>, vector<16x32xf32>
      %c0_42 = arith.constant 0 : index
      %c0_43 = arith.constant 0 : index
      %35 = vector.load %arg10[%c0_42, %c0_43] : memref<1x32xf32, #tpu.memory_space<vmem>>, vector<1x32xf32>
      %36 = vector.broadcast %35 : vector<1x32xf32> to vector<16x32xf32>
      %37 = arith.addf %34, %36 : vector<16x32xf32>
      %c0_44 = arith.constant 0 : index
      %c0_45 = arith.constant 0 : index
      %38 = vector.load %arg13[%c0_44, %c0_45] : memref<16x32xf32, #tpu.memory_space<vmem>>, vector<16x32xf32>
      tpu.vector_store %arg13[%c0_44, %c0_45], %37 {strides = array<i32>} : memref<16x32xf32, #tpu.memory_space<vmem>>, vector<16x32xf32>,
    } else {
    }
    return
  }
  func.func @transform_0(%arg0: i32, %arg1: i32) -> (i32, i32) {
    %c0_i32 = arith.constant 0 : i32
    return %arg0, %arg1 : i32, i32
  }
  func.func @transform_1(%arg0: i32, %arg1: i32) -> (i32, i32) {
    %c0_i32 = arith.constant 0 : i32
    return %arg0, %arg1 : i32, i32
  }
  func.func @transform_2(%arg0: i32, %arg1: i32) -> (i32, i32) {
    %c0_i32 = arith.constant 0 : i32
    return %arg0, %arg1 : i32, i32
  }
  func.func @transform_3(%arg0: i32, %arg1: i32) -> (i32, i32) {
    %c0_i32 = arith.constant 0 : i32
    %c0_i32_0 = arith.constant 0 : i32
    return %arg1, %c0_i32 : i32, i32
  }
  func.func @transform_4(%arg0: i32, %arg1: i32) -> (i32, i32) {
    %c0_i32 = arith.constant 0 : i32
    %c0_i32_0 = arith.constant 0 : i32
    return %arg1, %c0_i32 : i32, i32
  }
  func.func @transform_5(%arg0: i32, %arg1: i32) -> (i32, i32) {
    %c0_i32 = arith.constant 0 : i32
    %c0_i32_0 = arith.constant 0 : i32
    return %arg1, %c0_i32 : i32, i32
  }
  func.func @transform_6(%arg0: i32, %arg1: i32) -> (i32, i32) {
    %c0_i32 = arith.constant 0 : i32
    %c0_i32_0 = arith.constant 0 : i32
    %c0_i32_1 = arith.constant 0 : i32
    return %c0_i32, %c0_i32_0 : i32, i32
  }
  func.func @transform_7(%arg0: i32, %arg1: i32) -> (i32, i32) {
    %c0_i32 = arith.constant 0 : i32
    %c0_i32_0 = arith.constant 0 : i32
    %c0_i32_1 = arith.constant 0 : i32
    return %c0_i32, %c0_i32_0 : i32, i32
  }
  func.func @transform_8(%arg0: i32, %arg1: i32) -> (i32, i32) {
    %c0_i32 = arith.constant 0 : i32
    %c0_i32_0 = arith.constant 0 : i32
    %c0_i32_1 = arith.constant 0 : i32
    return %c0_i32, %c0_i32_0 : i32, i32
  }
  func.func @transform_9(%arg0: i32, %arg1: i32) -> (i32, i32) {
    %c0_i32 = arith.constant 0 : i32
    %c0_i32_0 = arith.constant 0 : i32
    return %arg0, %c0_i32 : i32, i32
  }
  func.func @transform_10(%arg0: i32, %arg1: i32) -> (i32, i32) {
    %c0_i32 = arith.constant 0 : i32
    %c0_i32_0 = arith.constant 0 : i32
    return %arg0, %c0_i32 : i32, i32
  }
  func.func @transform_11(%arg0: i32, %arg1: i32) -> (i32, i32) {
    %c0_i32 = arith.constant 0 : i32
    %c0_i32_0 = arith.constant 0 : i32
    return %arg0, %c0_i32 : i32, i32
  }
}

</mosaic_0001>

<bundles_post_ra>
// kernel: tpu_custom_call.1
= control target key start
LH: loop header
LB: loop body
LE: loop exit
PB: predicated region body
PF: predicated region fallthrough
CT: control target
= control target key end

     0   :  { %17 = vsyncpa [#allocation6], 0  ;;  %s1077_s0 = inlined_call_operand.hbm [shape: f32[16,32], index: 0, kind: input, shape index: {}]   ;;  %s1078_s1 = inlined_call_operand.hbm [shape: f32[16,32], index: 1, kind: input, shape index: {}]   ;;  %s1079_s2 = inlined_call_operand.hbm [shape: f32[16,32], index: 2, kind: input, shape index: {}]   ;;  %s1080_s3 = inlined_call_operand.hbm [shape: f32[32,32], index: 3, kind: input, shape index: {}]   ;;  %s1081_s4 = inlined_call_operand.hbm [shape: f32[32,32], index: 4, kind: input, shape index: {}]   ;;  %s1082_s5 = inlined_call_operand.hbm [shape: f32[32,32], index: 5, kind: input, shape index: {}]   ;;  %s1083_s6 = inlined_call_operand.vmem [shape: f32[1,32], index: 6, kind: input, shape index: {}]   ;;  %s1084_s7 = inlined_call_operand.vmem [shape: f32[1,32], index: 7, kind: input, shape index: {}]   ;;  %s1085_s8 = inlined_call_operand.vmem [shape: f32[1,32], index: 8, kind: input, shape index: {}]   ;;  %s1086_s9 = inlined_call_operand.hbm [shape: f32[16,32], index: 9, kind: output, shape index: {0}]   ;;  %s1087_s10 = inlined_call_operand.hbm [shape: f32[16,32], index: 10, kind: output, shape index: {1}]   ;;  %s1088_s11 = inlined_call_operand.hbm [shape: f32[16,32], index: 11, kind: output, shape index: {2}]  }
   0x1   :  { %18 = vsyncpa [#allocation9], 0 }
   0x2   :  { %19 = vsyncpa [#allocation12], 0 }
   0x3   :  { %20 = vsyncpa [#allocation15], 0 }
   0x4   :  { %21 = vsyncpa [#allocation7], 0 }
   0x5   :  { %22 = vsyncpa [#allocation18], 0  ;;  %s809_s17 = smov [#allocation8]   ;;  %s810_s19 = smov [#allocation11]  }
   0x6   :  { %s40_s18 = sshll.u32 %s809_s17, 4  ;;  %s64_s20 = sshll.u32 %s810_s19, 4  ;;  %s41_s18 = int_to_ptr.vmem [resolvable:$true] %s40_s18  ;;  %s881_s20 = int_to_ptr.vmem [resolvable:$true] %s64_s20 }
   0x7   :  { %s599_s23 = scalar_lea.hbm %s1078_s1, 256 }
   0x8   :  { %p600_p0 = scmp.ne.s32.totalorder %s1078_s1, %s599_s23  ;;  %p603_p1 = scmp.lt.u32.totalorder %s599_s23, %s1078_s1 }
   0xa   :  { %p605_p2 = pnand %p603_p1, %p600_p0 }
   0xc   :  { %608 = shalt.err (!%p605_p2)
}
   0xd   :  { %s609_s28 = scalar_lea.vmem %s41_s18, 256  ;;  %p614_p4 = scmp.lt.s32.totalorder %s41_s18, %s41_s18 }
   0xe   :  { %p610_p3 = scmp.ne.s32.totalorder %s41_s18, %s609_s28  ;;  %p615_p5 = scmp.lt.s32.totalorder %s609_s28, %s609_s28 }
  0x10   :  { %p616_p6 = por %p615_p5, %p614_p4 }
  0x12   :  { %p617_p7 = pnand %p616_p6, %p610_p3 }
  0x14   :  { %620 = shalt.err (!%p617_p7)
}
  0x15   :  { %s811_s29 = smov 128   ;;  %s812_s30 = smov 8  }
  0x16   :  { %46 = dma.hbm_to_vmem [thread:$0]  %s1078_s1, 256, %s41_s18, [#allocation9], %s811_s29, %s811_s29, %s812_s30  }
  0x17   :  { %s621_s16 = scalar_lea.hbm %s1080_s3, 512 }
  0x18   :  { %p622_p8 = scmp.ne.s32.totalorder %s1080_s3, %s621_s16  ;;  %p625_p9 = scmp.lt.u32.totalorder %s621_s16, %s1080_s3 }
  0x1a   :  { %p627_p10 = pnand %p625_p9, %p622_p8 }
  0x1c   :  { %630 = shalt.err (!%p627_p10)
}
  0x1d   :  { %s631_s23 = scalar_lea.vmem %s881_s20, 512  ;;  %p636_p12 = scmp.lt.s32.totalorder %s881_s20, %s881_s20 }
  0x1e   :  { %p632_p11 = scmp.ne.s32.totalorder %s881_s20, %s631_s23  ;;  %p637_p13 = scmp.lt.s32.totalorder %s631_s23, %s631_s23 }
  0x20   :  { %p638_p0 = por %p637_p13, %p636_p12 }
  0x22   :  { %p639_p1 = pnand %p638_p0, %p632_p11 }
  0x24   :  { %642 = shalt.err (!%p639_p1)
}
  0x25   :  { %70 = dma.hbm_to_vmem [thread:$0]  %s1080_s3, 512, %s881_s20, [#allocation12], %s811_s29, %s811_s29, %s812_s30  }
  0x26   :  { %s813_s24 = smov [#allocation5]   ;;  %s814_s26 = smov [#allocation10]  }
  0x27   :  { %s28_s25 = sshll.u32 %s813_s24, 4  ;;  %s52_s27 = sshll.u32 %s814_s26, 4  ;;  %s29_s25 = int_to_ptr.vmem [resolvable:$true] %s28_s25  ;;  %s918_s27 = int_to_ptr.vmem [resolvable:$true] %s52_s27 }
  0x28   :  { %s643_s13 = scalar_lea.hbm %s1077_s0, 256 }
  0x29   :  { %p644_p2 = scmp.ne.s32.totalorder %s1077_s0, %s643_s13  ;;  %p647_p3 = scmp.lt.u32.totalorder %s643_s13, %s1077_s0 }
  0x2b   :  { %p649_p4 = pnand %p647_p3, %p644_p2 }
  0x2d   :  { %652 = shalt.err (!%p649_p4)
}
  0x2e   :  { %s653_s3 = scalar_lea.vmem %s29_s25, 256  ;;  %p658_p6 = scmp.lt.s32.totalorder %s29_s25, %s29_s25 }
  0x2f   :  { %p654_p5 = scmp.ne.s32.totalorder %s29_s25, %s653_s3  ;;  %p659_p7 = scmp.lt.s32.totalorder %s653_s3, %s653_s3 }
  0x31   :  { %p660_p8 = por %p659_p7, %p658_p6 }
  0x33   :  { %p661_p9 = pnand %p660_p8, %p654_p5 }
  0x35   :  { %664 = shalt.err (!%p661_p9)
}
  0x36   :  { %34 = dma.hbm_to_vmem [thread:$0]  %s1077_s0, 256, %s29_s25, [#allocation6], %s811_s29, %s811_s29, %s812_s30  }
  0x37   :  { %s665_s23 = scalar_lea.hbm %s1079_s2, 256 }
  0x38   :  { %p666_p10 = scmp.ne.s32.totalorder %s1079_s2, %s665_s23  ;;  %p669_p11 = scmp.lt.u32.totalorder %s665_s23, %s1079_s2 }
  0x3a   :  { %p671_p12 = pnand %p669_p11, %p666_p10 }
  0x3c   :  { %674 = shalt.err (!%p671_p12)
}
  0x3d   :  { %s675_s28 = scalar_lea.vmem %s918_s27, 256  ;;  %p680_p0 = scmp.lt.s32.totalorder %s918_s27, %s918_s27 }
  0x3e   :  { %p676_p13 = scmp.ne.s32.totalorder %s918_s27, %s675_s28  ;;  %p681_p1 = scmp.lt.s32.totalorder %s675_s28, %s675_s28 }
  0x40   :  { %p682_p2 = por %p681_p1, %p680_p0 }
  0x42   :  { %p683_p3 = pnand %p682_p2, %p676_p13 }
  0x44   :  { %686 = shalt.err (!%p683_p3)
}
  0x45   :  { %58 = dma.hbm_to_vmem [thread:$0]  %s1079_s2, 256, %s918_s27, [#allocation9], %s811_s29, %s811_s29, %s812_s30  }
  0x46   :  { %s815_s12 = smov [#allocation13]   ;;  %s816_s14 = smov [#allocation14]  }
  0x47   :  { %s76_s13 = sshll.u32 %s815_s12, 4  ;;  %s88_s15 = sshll.u32 %s816_s14, 4  ;;  %s77_s13 = int_to_ptr.vmem [resolvable:$true] %s76_s13  ;;  %s955_s15 = int_to_ptr.vmem [resolvable:$true] %s88_s15 }
  0x48   :  { %s687_s3 = scalar_lea.hbm %s1081_s4, 512 }
  0x49   :  { %p688_p4 = scmp.ne.s32.totalorder %s1081_s4, %s687_s3  ;;  %p691_p5 = scmp.lt.u32.totalorder %s687_s3, %s1081_s4 }
  0x4b   :  { %p693_p6 = pnand %p691_p5, %p688_p4 }
  0x4d   :  { %696 = shalt.err (!%p693_p6)
}
  0x4e   :  { %s697_s2 = scalar_lea.vmem %s77_s13, 512  ;;  %p702_p8 = scmp.lt.s32.totalorder %s77_s13, %s77_s13 }
  0x4f   :  { %p698_p7 = scmp.ne.s32.totalorder %s77_s13, %s697_s2  ;;  %p703_p9 = scmp.lt.s32.totalorder %s697_s2, %s697_s2 }
  0x51   :  { %p704_p10 = por %p703_p9, %p702_p8 }
  0x53   :  { %p705_p11 = pnand %p704_p10, %p698_p7 }
  0x55   :  { %708 = shalt.err (!%p705_p11)
}
  0x56   :  { %82 = dma.hbm_to_vmem [thread:$0]  %s1081_s4, 512, %s77_s13, [#allocation12], %s811_s29, %s811_s29, %s812_s30  }
  0x57   :  { %s709_s24 = scalar_lea.hbm %s1082_s5, 512 }
  0x58   :  { %p710_p12 = scmp.ne.s32.totalorder %s1082_s5, %s709_s24  ;;  %p713_p13 = scmp.lt.u32.totalorder %s709_s24, %s1082_s5 }
  0x5a   :  { %p715_p0 = pnand %p713_p13, %p710_p12 }
  0x5c   :  { %718 = shalt.err (!%p715_p0)
}
  0x5d   :  { %s719_s12 = scalar_lea.vmem %s955_s15, 512  ;;  %p724_p2 = scmp.lt.s32.totalorder %s955_s15, %s955_s15 }
  0x5e   :  { %p720_p1 = scmp.ne.s32.totalorder %s955_s15, %s719_s12  ;;  %p725_p3 = scmp.lt.s32.totalorder %s719_s12, %s719_s12 }
  0x60   :  { %p726_p4 = por %p725_p3, %p724_p2 }
  0x62   :  { %p727_p5 = pnand %p726_p4, %p720_p1 }
  0x64   :  { %730 = shalt.err (!%p727_p5)
}
  0x65   :  { %94 = dma.hbm_to_vmem [thread:$0]  %s1082_s5, 512, %s955_s15, [#allocation15], %s811_s29, %s811_s29, %s812_s30  }
  0x66   :  { %797 = dma.done.wait [#allocation6], 256  }
  0x67   :  { %798 = vsyncadd [#allocation6], 4294967040 }
  0x68   :  { %799 = dma.done.wait [#allocation9], 512  }
  0x69   :  { %800 = vsyncadd [#allocation9], 4294966784 }
  0x6a   :  { %801 = dma.done.wait [#allocation12], 1024  }
  0x6b   :  { %802 = vsyncadd [#allocation12], 4294966272 }
  0x6c   :  { %803 = dma.done.wait [#allocation15], 512  }
  0x6d   :  { %804 = vsyncadd [#allocation15], 4294966784  ;;  %vm123_vm0 = vcmask 261120   ;;  %v817_v0 = vmov 0.0   ;;  %v134_v1 = vld [vmem:[#allocation11] sm:$0xff]  ;;  %v135_v2 = vld [vmem:[#allocation11 + $0x8] sm:$0xff] }
  0x6e   :  { %125 = vst.msk [vmem:[#allocation2 + $0x8] sm:$0xff] %vm123_vm0, %v817_v0  ;;  %124 = vst.msk [vmem:[#allocation2] sm:$0xff] %vm123_vm0, %v817_v0  ;;  %v136_v3 = vld [vmem:[#allocation11 + $0x10] sm:$0xff]  ;;  %v563_v4 = vpack.c.bf16 %v135_v2, %v134_v1  ;;  %v137_v5 = vld [vmem:[#allocation11 + $0x18] sm:$0xff]  ;;  %s818_s17 = smov [#allocation16]   ;;  %s819_s20 = smov [#allocation17]  }
  0x6f   :  { %126 = vst.msk [vmem:[#allocation3] sm:$0xff] %vm123_vm0, %v817_v0  ;;  %127 = vst.msk [vmem:[#allocation3 + $0x8] sm:$0xff] %vm123_vm0, %v817_v0  ;;  %v228_v6 = vld [vmem:[#allocation13] sm:$0xff]  ;;  %v229_v7 = vld [vmem:[#allocation13 + $0x8] sm:$0xff]  ;;  %v567_v8 = vpack.c.bf16 %v137_v5, %v136_v3  ;;  %s457_s3 = sshll.u32 %s818_s17, 4  ;;  %s469_s19 = sshll.u32 %s819_s20, 4  ;;  %s458_s3 = int_to_ptr.vmem [resolvable:$true] %s457_s3  ;;  %s1016_s19 = int_to_ptr.vmem [resolvable:$true] %s469_s19 }
  0x70   :  { %128 = vst.msk [vmem:[#allocation4] sm:$0xff] %vm123_vm0, %v817_v0  ;;  %129 = vst.msk [vmem:[#allocation4 + $0x8] sm:$0xff] %vm123_vm0, %v817_v0  ;;  %v571_v9 = vpack.c.bf16 %v229_v7, %v228_v6  ;;  %v132_v10 = vld [vmem:[#allocation5] sm:$0xff]  ;;  %v321_v11 = vld [vmem:[#allocation14] sm:$0xff]  ;;  %564 = vmatprep.subr.bf16.mxu0 %v563_v4  ;;  %s731_s21 = scalar_lea.vmem %s458_s3, 256  ;;  %p736_p7 = scmp.lt.s32.totalorder %s458_s3, %s458_s3 }
  0x71   :  { %538 = vmatprep.mubr.msk.f32.mxu0 %vm123_vm0, %v132_v10  ;;  %v322_v12 = vld [vmem:[#allocation14 + $0x8] sm:$0xff]  ;;  %v230_v13 = vld [vmem:[#allocation13 + $0x10] sm:$0xff]  ;;  %v231_v14 = vld [vmem:[#allocation13 + $0x18] sm:$0xff]  ;;  %566 = vmatpush3.bf16.msra.mxu0 %v563_v4  ;;  %p732_p6 = scmp.ne.s32.totalorder %s458_s3, %s731_s21  ;;  %p737_p8 = scmp.lt.s32.totalorder %s731_s21, %s731_s21 }
  0x72   :  { %572 = vmatprep.subr.bf16.mxu1 %v571_v9  ;;  %v575_v15 = vpack.c.bf16 %v231_v14, %v230_v13  ;;  %v226_v16 = vld [vmem:[#allocation8] sm:$0xff]  ;;  %568 = vmatprep.subr.bf16.mxu0 %v567_v8  ;;  %v579_v17 = vpack.c.bf16 %v322_v12, %v321_v11  ;;  %v323_v18 = vld [vmem:[#allocation14 + $0x10] sm:$0xff]  ;;  %v324_v19 = vld [vmem:[#allocation14 + $0x18] sm:$0xff] }
  0x73   :  { %574 = vmatpush3.bf16.msra.mxu1 %v571_v9  ;;  %549 = vmatprep.mubr.msk.f32.mxu1 %vm123_vm0, %v226_v16  ;;  %v133_v20 = vld [vmem:[#allocation5 + $0x8] sm:$0xff]  ;;  %v583_v21 = vpack.c.bf16 %v324_v19, %v323_v18  ;;  %v227_v22 = vld [vmem:[#allocation8 + $0x8] sm:$0xff]  ;;  %v319_v23 = vld [vmem:[#allocation10] sm:$0xff]  ;;  %p738_p9 = por %p737_p8, %p736_p7 }
  0x74   :  { %576 = vmatprep.subr.bf16.mxu1 %v575_v15  ;;  %v320_v24 = vld [vmem:[#allocation10 + $0x8] sm:$0xff]  ;;  %v509_v40 = vld [vmem:[%s1083_s6] ss:$0 sm:$0xff] }
  0x75   :  { %570 = vmatpush3.bf16.msra.mxu0 %v567_v8  ;;  %v131_v25 = vld [vmem:[#allocation2 + $0x8] sm:$0xff]  ;;  %v130_v26 = vld [vmem:[#allocation2] sm:$0xff]  ;;  %p739_p10 = pnand %p738_p9, %p732_p6 }
  0x76   :  { %580 = vmatprep.subr.bf16.mxu0 %v579_v17  ;;  %v225_v27 = vld [vmem:[#allocation3 + $0x8] sm:$0xff]  ;;  %v224_v29 = vld [vmem:[#allocation3] sm:$0xff]  ;;  %v510_v43 = vld [vmem:[%s1084_s7] ss:$0 sm:$0xff] }
  0x77   :  { %578 = vmatpush3.bf16.msra.mxu1 %v575_v15  ;;  %v318_v37 = vld [vmem:[#allocation4 + $0x8] sm:$0xff]  ;;  %v317_v38 = vld [vmem:[#allocation4] sm:$0xff] }
  0x78   :  { %539 = vmatmul.mubr.msk.f32.vlgmr.msra.gmra.mrb[0].mxu0 %vm123_vm0, %v133_v20  ;;  %v511_v53 = vld [vmem:[%s1085_s8] ss:$0 sm:$0xff] }
  0x79   :  { %582 = vmatpush3.bf16.msra.mxu0 %v579_v17  ;;  %560 = vmatprep.mubr.msk.f32.mxu0 %vm123_vm0, %v319_v23 }
  0x7a   :  { %550 = vmatmul.mubr.msk.f32.vlgmr.msra.gmra.mrb[0].mxu1 %vm123_vm0, %v227_v22  ;;  %584 = vmatprep.subr.bf16.mxu0 %v583_v21 }
  0x7d   :  { %586 = vmatpush3.bf16.msra.mxu0 %v583_v21 }
  0x80   :  { %561 = vmatmul.mubr.msk.f32.vlgmr.msra.gmra.mrb[2].mxu0 %vm123_vm0, %v320_v24 }
 0x14b   :  { %v540_v28 = vpop.f32.mrb[0].mxu0 }
 0x14c   :  { %v221_v30 = vadd.f32 %v540_v28, %v131_v25  ;;  %v211_v31 = vpop.f32.mrb[1].mxu0 }
 0x14d   :  { %v551_v32 = vpop.f32.mrb[0].mxu1  ;;  %v220_v33 = vadd.f32 %v211_v31, %v130_v26 }
 0x14e   :  { %v314_v34 = vadd.f32 %v551_v32, %v225_v27  ;;  %v304_v35 = vpop.f32.mrb[1].mxu1  ;;  %223 = vst.msk [vmem:[#allocation2 + $0x8] sm:$0xff] %vm123_vm0, %v221_v30 }
 0x14f   :  { %v313_v36 = vadd.f32 %v304_v35, %v224_v29  ;;  %222 = vst.msk [vmem:[#allocation2] sm:$0xff] %vm123_vm0, %v220_v33 }
 0x150   :  { %316 = vst.msk [vmem:[#allocation3 + $0x8] sm:$0xff] %vm123_vm0, %v314_v34 }
 0x151   :  { %315 = vst.msk [vmem:[#allocation3] sm:$0xff] %vm123_vm0, %v313_v36 }
 0x153   :  { %v562_v39 = vpop.f32.mrb[2].mxu0 }
 0x154   :  { %v407_v41 = vadd.f32 %v562_v39, %v318_v37  ;;  %v397_v42 = vpop.f32.mrb[3].mxu0 }
 0x155   :  { %v406_v44 = vadd.f32 %v397_v42, %v317_v38  ;;  %v414_v45 = vld [vmem:[#allocation2 + $0x8] sm:$0xff] }
 0x156   :  { %409 = vst.msk [vmem:[#allocation4 + $0x8] sm:$0xff] %vm123_vm0, %v407_v41  ;;  %v413_v47 = vld [vmem:[#allocation2] sm:$0xff]  ;;  %v423_v48 = vadd.f32 %v509_v40, %v414_v45 }
 0x157   :  { %v427_v46 = vld [vmem:[#allocation3 + $0x8] sm:$0xff]  ;;  %408 = vst.msk [vmem:[#allocation4] sm:$0xff] %vm123_vm0, %v406_v44  ;;  %v422_v51 = vadd.f32 %v509_v40, %v413_v47 }
 0x158   :  { %v426_v49 = vld [vmem:[#allocation3] sm:$0xff]  ;;  %v436_v50 = vadd.f32 %v510_v43, %v427_v46  ;;  %425 = vst.msk [vmem:[#allocation16 + $0x8] sm:$0xff] %vm123_vm0, %v423_v48 }
 0x159   :  { %v435_v52 = vadd.f32 %v510_v43, %v426_v49  ;;  %424 = vst.msk [vmem:[#allocation16] sm:$0xff] %vm123_vm0, %v422_v51 }
 0x15a   :  { %438 = vst.msk [vmem:[#allocation17 + $0x8] sm:$0xff] %vm123_vm0, %v436_v50 }
 0x15b   :  { %437 = vst.msk [vmem:[#allocation17] sm:$0xff] %vm123_vm0, %v435_v52 }
 0x15c   :  { %742 = shalt.err (!%p739_p10)
}
 0x15d   :  { %s743_s27 = scalar_lea.hbm %s1086_s9, 256 }
 0x15e   :  { %p744_p11 = scmp.ne.s32.totalorder %s1086_s9, %s743_s27  ;;  %p747_p12 = scmp.lt.u32.totalorder %s743_s27, %s1086_s9 }
 0x160   :  { %p749_p13 = pnand %p747_p12, %p744_p11 }
 0x162   :  { %752 = shalt.err (!%p749_p13)
}
 0x163   :  { %463 = dma.vmem_to_hbm [thread:$0]  %s458_s3, 256, %s1086_s9, [#allocation7], %s811_s29, %s811_s29, %s812_s30  }
 0x164   :  { %s753_s28 = scalar_lea.vmem %s1016_s19, 256  ;;  %p758_p1 = scmp.lt.s32.totalorder %s1016_s19, %s1016_s19 }
 0x165   :  { %p754_p0 = scmp.ne.s32.totalorder %s1016_s19, %s753_s28  ;;  %p759_p2 = scmp.lt.s32.totalorder %s753_s28, %s753_s28 }
 0x167   :  { %p760_p3 = por %p759_p2, %p758_p1 }
 0x169   :  { %p761_p4 = pnand %p760_p3, %p754_p0 }
 0x16b   :  { %764 = shalt.err (!%p761_p4)
}
 0x16c   :  { %s765_s12 = scalar_lea.hbm %s1087_s10, 256 }
 0x16d   :  { %p766_p5 = scmp.ne.s32.totalorder %s1087_s10, %s765_s12  ;;  %p769_p6 = scmp.lt.u32.totalorder %s765_s12, %s1087_s10 }
 0x16f   :  { %p771_p7 = pnand %p769_p6, %p766_p5 }
 0x171   :  { %774 = shalt.err (!%p771_p7)
}
 0x172   :  { %475 = dma.vmem_to_hbm [thread:$0]  %s1016_s19, 256, %s1087_s10, [#allocation18], %s811_s29, %s811_s29, %s812_s30   ;;  %v440_v54 = vld [vmem:[#allocation4 + $0x8] sm:$0xff]  ;;  %v439_v55 = vld [vmem:[#allocation4] sm:$0xff] }
 0x173   :  { %s820_s16 = smov [#allocation19]   ;;  %v449_v56 = vadd.f32 %v511_v53, %v440_v54  ;;  %v448_v57 = vadd.f32 %v511_v53, %v439_v55 }
 0x174   :  { %s481_s17 = sshll.u32 %s820_s16, 4  ;;  %s482_s17 = int_to_ptr.vmem [resolvable:$true] %s481_s17 }
 0x175   :  { %451 = vst.msk [vmem:[#allocation19 + $0x8] sm:$0xff] %vm123_vm0, %v449_v56  ;;  %450 = vst.msk [vmem:[#allocation19] sm:$0xff] %vm123_vm0, %v448_v57  ;;  %s775_s3 = scalar_lea.vmem %s482_s17, 256  ;;  %p780_p9 = scmp.lt.s32.totalorder %s482_s17, %s482_s17 }
 0x176   :  { %p776_p8 = scmp.ne.s32.totalorder %s482_s17, %s775_s3  ;;  %p781_p10 = scmp.lt.s32.totalorder %s775_s3, %s775_s3 }
 0x178   :  { %p782_p11 = por %p781_p10, %p780_p9 }
 0x17a   :  { %p783_p12 = pnand %p782_p11, %p776_p8 }
 0x17c   :  { %786 = shalt.err (!%p783_p12)
}
 0x17d   :  { %s787_s19 = scalar_lea.hbm %s1088_s11, 256 }
 0x17e   :  { %p788_p13 = scmp.ne.s32.totalorder %s1088_s11, %s787_s19  ;;  %p791_p0 = scmp.lt.u32.totalorder %s787_s19, %s1088_s11 }
 0x180   :  { %p793_p1 = pnand %p791_p0, %p788_p13 }
 0x182   :  { %796 = shalt.err (!%p793_p1)
}
 0x183   :  { %487 = dma.vmem_to_hbm [thread:$0]  %s482_s17, 256, %s1088_s11, [#allocation18], %s811_s29, %s811_s29, %s812_s30  }
 0x184   :  { %805 = dma.done.wait [#allocation7], 256  }
 0x185   :  { %806 = vsyncadd [#allocation7], 4294967040 }
 0x186   :  { %807 = dma.done.wait [#allocation18], 512  }
 0x187   :  { %808 = vsyncadd [#allocation18], 4294966784 }
 0x188   :  { %497 = vsyncpa [#allocation6], 1 }
 0x189   :  { %498 = vsyncpa [#allocation9], 1 }
 0x18a   :  { %499 = vsyncpa [#allocation12], 1 }
 0x18b   :  { %500 = vsyncpa [#allocation15], 1 }
 0x18c   :  { %501 = vsyncpa [#allocation7], 1 }
 0x18d   :  { %502 = vsyncpa [#allocation18], 1 }

</bundles_post_ra>
